<compile_context>
chip_gen: v7x
topology: tpu7x:2x2x1
jax: 0.10.0
libtpu: 0.0.40
codegen_flags: <defaults>
</compile_context>

<pallas_src>
import jax
import jax.numpy as jnp
from jax.experimental import pallas as pl
from jax.experimental.pallas import tpu as pltpu

LN_EPS = 1e-5  # torch.nn.LayerNorm default


# --------------------------------------------------------------------------- utils

def _round_up(x, m):
    return ((x + m - 1) // m) * m


def _vmem_capacity_bytes():
    """Physical VMEM per TensorCore; conservative 64 MiB (v7x) fallback."""
    try:
        cap = int(pltpu.get_tpu_info().vmem_capacity_bytes)
        if cap > 0:
            return cap
    except Exception:
        pass
    return 64 << 20


def _num_tensorcores():
    """2 on v7x (2 TCs/chip), else 1 (v5e/v6e)."""
    try:
        kind = jax.devices()[0].device_kind.lower()
        if "v7" in kind:
            return 2
    except Exception:
        pass
    return 1


def _pick_divisor_tile(n, candidates=(512, 256, 128)):
    """Largest MXU-friendly tile that exactly divides n (n is a multiple of 128)."""
    for c in candidates:
        if n % c == 0:
            return c
    return n


def _layernorm(h, real_d, padded_d):
    """Row LayerNorm (no affine) over the first `real_d` of `padded_d` columns.
    Padded columns of h are exactly zero on entry; they come out as zero too."""
    if padded_d == real_d:
        mean = jnp.mean(h, axis=-1, keepdims=True)
        centered = h - mean
        var = jnp.mean(centered * centered, axis=-1, keepdims=True)
        return centered * jax.lax.rsqrt(var + LN_EPS)
    mask = jax.lax.broadcasted_iota(jnp.int32, h.shape, 1) < real_d
    inv_d = 1.0 / float(real_d)
    hm = jnp.where(mask, h, 0.0)
    mean = jnp.sum(hm, axis=-1, keepdims=True) * inv_d
    centered = jnp.where(mask, h - mean, 0.0)
    var = jnp.sum(centered * centered, axis=-1, keepdims=True) * inv_d
    return centered * jax.lax.rsqrt(var + LN_EPS)


# ------------------------------------------------------------------ resident kernel

def make_mlp_kernel(num_linear, layer_normalized, real_out_dim, padded_out_dim):
    """Fully fused MLP; refs = (x, w0, b0, w1, b1, ..., out). Biases arrive f32."""

    def kernel(*refs):
        x_ref = refs[0]
        o_ref = refs[-1]
        params = refs[1:-1]

        h = x_ref[...]
        for i in range(num_linear):
            w_ref = params[2 * i]          # [in, out], whole array resident in VMEM
            b = params[2 * i + 1][...]     # [1, out], already f32
            lhs = h if h.dtype == w_ref.dtype else h.astype(w_ref.dtype)
            h = jnp.dot(lhs, w_ref[...], preferred_element_type=jnp.float32) + b
            if i < num_linear - 1:
                h = jnp.maximum(h, 0.0)
                nxt_dtype = params[2 * (i + 1)].dtype
                if nxt_dtype != jnp.float32:
                    # cast back early so only one live f32 copy of the widest
                    # intermediate exists at a time
                    h = h.astype(nxt_dtype)

        if layer_normalized:
            h = _layernorm(h.astype(jnp.float32), real_out_dim, padded_out_dim)

        o_ref[...] = h.astype(o_ref.dtype)

    return kernel


def _choose_block_m(batch, row_align, act_bytes, input_dim, out_pad, widest,
                    act_budget_bytes, num_cores, max_tile):
    """Batch tile: as large as the VMEM budget allows (up to max_tile), MXU/sublane
    aligned, and >=num_cores grid steps whenever there are enough rows."""
    padded = _round_up(batch, row_align)
    min_blocks = num_cores if (num_cores > 1 and padded >= 2 * row_align) else 1

    block_m = _round_up(min(padded, max_tile), row_align)
    if pl.cdiv(batch, block_m) < min_blocks:
        block_m = _round_up(pl.cdiv(padded, min_blocks), row_align)
    if block_m >= 128:
        cand = _round_up(block_m, 128)   # MXU-friendly M tiles
        if pl.cdiv(batch, cand) >= min_blocks:
            block_m = cand

    def footprint(bm):
        io = 2 * bm * (input_dim + out_pad) * act_bytes   # double-buffered x / out
        live = 2 * bm * widest * 4                        # live f32 intermediates
        return io + live

    while block_m > row_align and footprint(block_m) > act_budget_bytes:
        block_m = max(row_align, _round_up(block_m // 2, row_align))
    return block_m


# ------------------------------------------------------------- streaming fallback

def make_streamed_linear_kernel(apply_relu, apply_ln, real_out_dim, padded_out_dim):
    """One Linear (+ optional ReLU / LayerNorm) with K-reduction over the last grid
    axis and an f32 VMEM accumulator."""

    def kernel(x_ref, w_ref, b_ref, o_ref, acc_ref):
        k = pl.program_id(2)

        @pl.when(k == 0)
        def _():
            acc_ref[...] = jnp.zeros_like(acc_ref)

        lhs = x_ref[...]
        if lhs.dtype != w_ref.dtype:
            lhs = lhs.astype(w_ref.dtype)
        acc_ref[...] += jnp.dot(lhs, w_ref[...], preferred_element_type=jnp.float32)

        @pl.when(k == pl.num_programs(2) - 1)
        def _():
            h = acc_ref[...] + b_ref[...]
            if apply_relu:
                h = jnp.maximum(h, 0.0)
            if apply_ln:
                h = _layernorm(h, real_out_dim, padded_out_dim)
            o_ref[...] = h.astype(o_ref.dtype)

    return kernel


def _streamed_linear(h, w, b, *, apply_relu, apply_ln, block_m, vmem_capacity):
    """h: [M, K_pad] (K_pad multiple of 128, padded cols zero). Returns [M, N_pad]
    with padded cols exactly zero (so it chains as the next layer's padded K)."""
    m, k_avail = h.shape
    k_real, n_real = w.shape
    n_pad = _round_up(n_real, 128)

    # Zero padding keeps the math exact and keeps padded output columns exactly zero.
    w_p = jnp.zeros((k_avail, n_pad), w.dtype).at[:k_real, :n_real].set(w)
    b_p = jnp.zeros((1, n_pad), jnp.float32).at[:, :n_real].set(
        b.astype(jnp.float32).reshape(1, -1))

    block_k = _pick_divisor_tile(k_avail)
    block_n = n_pad if apply_ln else _pick_divisor_tile(n_pad)  # LN needs the full row

    act_bytes = jnp.dtype(h.dtype).itemsize
    w_bytes = jnp.dtype(w.dtype).itemsize
    footprint = (2 * block_m * block_k * act_bytes
                 + 2 * block_k * block_n * w_bytes
                 + 2 * block_n * 4
                 + 2 * block_m * block_n * act_bytes
                 + block_m * block_n * 4)
    vmem_limit = int(min(max(footprint * 1.25 + (4 << 20), 32 << 20),
                         vmem_capacity * 0.9))

    kernel = make_streamed_linear_kernel(apply_relu, apply_ln, n_real, n_pad)
    grid = (pl.cdiv(m, block_m), n_pad // block_n, k_avail // block_k)

    cost = pl.CostEstimate(
        flops=int(2 * m * k_real * n_real),
        transcendentals=int(m if apply_ln else 0),
        bytes_accessed=int(h.nbytes + w_p.nbytes + b_p.nbytes + m * n_pad * act_bytes))

    return pl.pallas_call(
        kernel,
        out_shape=jax.ShapeDtypeStruct((m, n_pad), h.dtype),
        grid=grid,
        in_specs=[
            pl.BlockSpec((block_m, block_k), lambda i, j, k: (i, k)),
            pl.BlockSpec((block_k, block_n), lambda i, j, k: (k, j)),
            pl.BlockSpec((1, block_n), lambda i, j, k: (0, j)),
        ],
        out_specs=pl.BlockSpec((block_m, block_n), lambda i, j, k: (i, j)),
        scratch_shapes=[pltpu.VMEM((block_m, block_n), jnp.float32)],
        compiler_params=pltpu.CompilerParams(
            dimension_semantics=("parallel", "parallel", "arbitrary"),
            vmem_limit_bytes=vmem_limit),
        cost_estimate=cost,
    )(h, w_p, b_p)


def _streamed_block_m(batch, row_align, num_cores):
    padded = _round_up(batch, row_align)
    bm = min(padded, 512)
    min_blocks = num_cores if (num_cores > 1 and padded >= 2 * row_align) else 1
    if pl.cdiv(batch, bm) < min_blocks:
        bm = _round_up(pl.cdiv(padded, min_blocks), row_align)
    if bm >= 128:
        cand = _round_up(bm, 128)
        if pl.cdiv(batch, cand) >= min_blocks:
            bm = cand
    return bm


def _mlp_forward_streamed(x, params, layer_normalized, block_m, vmem_capacity):
    batch, input_dim = x.shape
    num_linear = len(params)
    output_dim = params[-1][0].shape[1]

    k_pad0 = _round_up(input_dim, 128)
    h = x if k_pad0 == input_dim else jnp.pad(x, ((0, 0), (0, k_pad0 - input_dim)))
    for i, (w, b) in enumerate(params):
        is_last = i == num_linear - 1
        h = _streamed_linear(
            h, w, b,
            apply_relu=not is_last,
            apply_ln=is_last and layer_normalized,
            block_m=block_m,
            vmem_capacity=vmem_capacity)
    if h.shape[1] != output_dim:
        h = h[:, :output_dim]
    return h


# ----------------------------------------------------------------------- wrapper

def init_mlp_params(key, input_dim, latent_dim, output_dim, hidden_layers,
                    dtype=jnp.float32):
    """Deterministic params matching torch Linear shapes (stored transposed: [in, out])."""
    dims = []
    for l in range(hidden_layers):
        dims.append((input_dim if l == 0 else latent_dim, latent_dim))
    dims.append((latent_dim, output_dim))

    params = []
    for (din, dout) in dims:
        key, kw, kb = jax.random.split(key, 3)
        bound = 1.0 / (din ** 0.5)  # torch.nn.Linear default init range
        w = jax.random.uniform(kw, (din, dout), dtype, -bound, bound)
        b = jax.random.uniform(kb, (1, dout), dtype, -bound, bound)
        params.append((w, b))
    return params


def mlp_forward(x, params, layer_normalized=True, block_m=None, force_stream=False):
    """x: [batch, input_dim]. Returns [batch, output_dim]."""
    batch, input_dim = x.shape
    num_linear = len(params)
    output_dim = params[-1][0].shape[1]
    out_pad = _round_up(output_dim, 128)          # lane-dense output stores

    act_bytes = jnp.dtype(x.dtype).itemsize
    row_align = 16 if act_bytes == 2 else 8
    capacity = _vmem_capacity_bytes()
    num_cores = _num_tensorcores()

    feature_dims = [input_dim] + [w.shape[1] for (w, _) in params[:-1]] + [out_pad]
    widest = max(feature_dims)

    # Parameter footprint with the lane-padded last layer and f32 biases.
    param_bytes = 0
    for li, (w, _) in enumerate(params):
        n = out_pad if li == num_linear - 1 else w.shape[1]
        param_bytes += w.shape[0] * n * jnp.dtype(w.dtype).itemsize + n * 4

    budget = int(capacity * 0.85)                 # generation-aware VMEM budget
    act_budget = budget - param_bytes
    min_act = 2 * row_align * (input_dim + out_pad) * act_bytes + 2 * row_align * widest * 4

    if force_stream or act_budget < min_act:
        # Weights do not fit resident -> stream K/N tiles per layer.
        bm = block_m if block_m is not None else _streamed_block_m(batch, row_align, num_cores)
        return _mlp_forward_streamed(x, params, layer_normalized, bm, capacity)

    max_tile = 1024 if capacity >= (96 << 20) else 512   # bigger tiles on 128 MiB chips
    if block_m is None:
        block_m = _choose_block_m(batch, row_align, act_bytes, input_dim, out_pad,
                                  widest, act_budget, num_cores, max_tile)

    # Flatten params: biases pre-cast to f32 once (hoists the per-step cast out of the
    # kernel); last layer zero-padded to out_pad for unmasked full-lane stores.
    flat_params = []
    in_specs = [pl.BlockSpec((block_m, input_dim), lambda i: (i, 0))]
    for li, (w, b) in enumerate(params):
        b = b.reshape(1, -1).astype(jnp.float32)
        if li == num_linear - 1 and out_pad != output_dim:
            w = jnp.zeros((w.shape[0], out_pad), w.dtype).at[:, :output_dim].set(w)
            b = jnp.zeros((1, out_pad), jnp.float32).at[:, :output_dim].set(b)
        flat_params.extend([w, b])
        # Whole-array VMEM residency: DMA'd once, NOT double-buffered by the pipeline.
        in_specs.append(pl.BlockSpec(memory_space=pltpu.MemorySpace.VMEM))
        in_specs.append(pl.BlockSpec(memory_space=pltpu.MemorySpace.VMEM))

    kernel = make_mlp_kernel(num_linear, layer_normalized, output_dim, out_pad)

    # Scoped-VMEM limit sized from the actual buffers, clamped to physical capacity.
    vmem_needed = (param_bytes
                   + 2 * block_m * (input_dim + out_pad) * act_bytes
                   + 2 * block_m * widest * 4)
    vmem_limit = int(min(max(vmem_needed * 1.25 + (4 << 20), 32 << 20),
                         capacity * 0.9))

    flops = 2 * batch * sum(w.shape[0] * w.shape[1] for (w, _) in params)
    cost = pl.CostEstimate(
        flops=int(flops),
        transcendentals=int(batch if layer_normalized else 0),
        bytes_accessed=int(x.nbytes + batch * out_pad * act_bytes + param_bytes))

    out = pl.pallas_call(
        kernel,
        out_shape=jax.ShapeDtypeStruct((batch, out_pad), x.dtype),
        grid=(pl.cdiv(batch, block_m),),          # partial tail block handled by Pallas
        in_specs=in_specs,
        out_specs=pl.BlockSpec((block_m, out_pad), lambda i: (i, 0)),
        compiler_params=pltpu.CompilerParams(
            dimension_semantics=("parallel",),
            vmem_limit_bytes=vmem_limit),
        cost_estimate=cost,
    )(x, *flat_params)

    if out_pad != output_dim:
        out = out[:, :output_dim]
    return out


def mlp_reference(x, params, layer_normalized=True):
    h = x.astype(jnp.float32)
    for i, (w, b) in enumerate(params):
        h = h @ w.astype(jnp.float32) + b.astype(jnp.float32)
        if i < len(params) - 1:
            h = jnp.maximum(h, 0.0)
    if layer_normalized:
        mean = jnp.mean(h, axis=-1, keepdims=True)
        var = jnp.mean((h - mean) ** 2, axis=-1, keepdims=True)
        h = (h - mean) * jax.lax.rsqrt(var + LN_EPS)
    return h.astype(x.dtype)


if __name__ == "__main__":
    # Small shapes consistent with the module's forward: x is [batch, input_dim].
    input_dim, latent_dim, output_dim, hidden_layers = 16, 32, 16, 2

    key = jax.random.PRNGKey(0)
    kx1, kx2, kp = jax.random.split(key, 3)
    params = init_mlp_params(kp, input_dim, latent_dim, output_dim, hidden_layers)

    # Case 1: tiny batch, single grid step, resident-weights fused kernel.
    x_small = jax.random.normal(kx1, (8, input_dim), jnp.float32)
    out_small = jax.block_until_ready(mlp_forward(x_small, params, layer_normalized=True))
    ref_small = mlp_reference(x_small, params, layer_normalized=True)
    assert out_small.shape == (8, output_dim)
    assert jnp.allclose(out_small, ref_small, atol=1e-5, rtol=1e-5), "small-batch mismatch"

    # Case 2: ragged batch with forced block_m=128 -> 3 grid steps including a
    # partial tail block (no host-side pad/slice of the batch dimension).
    x_big = jax.random.normal(kx2, (300, input_dim), jnp.float32)
    out_big = jax.block_until_ready(mlp_forward(x_big, params, layer_normalized=True,
                                                block_m=128))
    ref_big = mlp_reference(x_big, params, layer_normalized=True)
    assert out_big.shape == (300, output_dim)
    assert jnp.allclose(out_big, ref_big, atol=1e-5, rtol=1e-5), "ragged-batch mismatch"

    # Case 3: weight-streaming fallback path (K/N-tiled linear layers with a
    # reduction grid axis), force-enabled at small shapes so it stays tested.
    out_stream = jax.block_until_ready(mlp_forward(x_big, params, layer_normalized=True,
                                                   force_stream=True))
    assert out_stream.shape == (300, output_dim)
    assert jnp.allclose(out_stream, ref_big, atol=1e-5, rtol=1e-5), "streamed-path mismatch"

    print("KERNEL_OK")
</pallas_src>

<mosaic_0001>
module attributes {stable_mosaic.version = 11 : i64} {
  func.func @kernel(%arg0: i32, %arg1: memref<8x16xf32, #tpu.memory_space<vmem>>, %arg2: memref<16x32xf32, #tpu.memory_space<vmem>>, %arg3: memref<1x32xf32, #tpu.memory_space<vmem>>, %arg4: memref<32x32xf32, #tpu.memory_space<vmem>>, %arg5: memref<1x32xf32, #tpu.memory_space<vmem>>, %arg6: memref<32x128xf32, #tpu.memory_space<vmem>>, %arg7: memref<1x128xf32, #tpu.memory_space<vmem>>, %arg8: memref<8x128xf32, #tpu.memory_space<vmem>>) attributes {dimension_semantics = [#tpu.dimension_semantics<parallel>], iteration_bounds = array<i64: 1>, scalar_prefetch = 0 : i64, scratch_operands = 0 : i64, tpu.core_type = #tpu.core_type<tc>, window_params = [{transform_indices = @transform_0, window_bounds = array<i64: 8, 16>}, {pipeline_mode = #tpu.pipeline_mode<synchronous>, transform_indices = @transform_1, window_bounds = array<i64: 16, 32>}, {pipeline_mode = #tpu.pipeline_mode<synchronous>, transform_indices = @transform_2, window_bounds = array<i64: 1, 32>}, {pipeline_mode = #tpu.pipeline_mode<synchronous>, transform_indices = @transform_3, window_bounds = array<i64: 32, 32>}, {pipeline_mode = #tpu.pipeline_mode<synchronous>, transform_indices = @transform_4, window_bounds = array<i64: 1, 32>}, {pipeline_mode = #tpu.pipeline_mode<synchronous>, transform_indices = @transform_5, window_bounds = array<i64: 32, 128>}, {pipeline_mode = #tpu.pipeline_mode<synchronous>, transform_indices = @transform_6, window_bounds = array<i64: 1, 128>}, {transform_indices = @transform_7, window_bounds = array<i64: 8, 128>}]} {
    %c0 = arith.constant 0 : index
    %c0_0 = arith.constant 0 : index
    %0 = vector.load %arg1[%c0, %c0_0] : memref<8x16xf32, #tpu.memory_space<vmem>>, vector<8x16xf32>
    %c0_1 = arith.constant 0 : index
    %c0_2 = arith.constant 0 : index
    %1 = vector.load %arg3[%c0_1, %c0_2] : memref<1x32xf32, #tpu.memory_space<vmem>>, vector<1x32xf32>
    %c0_3 = arith.constant 0 : index
    %c0_4 = arith.constant 0 : index
    %2 = vector.load %arg2[%c0_3, %c0_4] : memref<16x32xf32, #tpu.memory_space<vmem>>, vector<16x32xf32>
    %cst = arith.constant dense<0.000000e+00> : vector<8x32xf32>
    %3 = tpu.matmul %0, %2, %cst {dimension_numbers = #tpu.dot_dimension_numbers<[1], [0], [0], [1], [0, 0, 1, 1], [], []>} : vector<8x16xf32>, vector<16x32xf32>, vector<8x32xf32> -> vector<8x32xf32>
    %4 = vector.broadcast %1 : vector<1x32xf32> to vector<8x32xf32>
    %5 = arith.addf %3, %4 : vector<8x32xf32>
    %cst_5 = arith.constant 0.000000e+00 : f32
    %6 = vector.broadcast %cst_5 : f32 to vector<8x32xf32>
    %7 = arith.maximumf %5, %6 : vector<8x32xf32>
    %c0_6 = arith.constant 0 : index
    %c0_7 = arith.constant 0 : index
    %8 = vector.load %arg5[%c0_6, %c0_7] : memref<1x32xf32, #tpu.memory_space<vmem>>, vector<1x32xf32>
    %c0_8 = arith.constant 0 : index
    %c0_9 = arith.constant 0 : index
    %9 = vector.load %arg4[%c0_8, %c0_9] : memref<32x32xf32, #tpu.memory_space<vmem>>, vector<32x32xf32>
    %cst_10 = arith.constant dense<0.000000e+00> : vector<8x32xf32>
    %10 = tpu.matmul %7, %9, %cst_10 {dimension_numbers = #tpu.dot_dimension_numbers<[1], [0], [0], [1], [0, 0, 1, 1], [], []>} : vector<8x32xf32>, vector<32x32xf32>, vector<8x32xf32> -> vector<8x32xf32>
    %11 = vector.broadcast %8 : vector<1x32xf32> to vector<8x32xf32>
    %12 = arith.addf %10, %11 : vector<8x32xf32>
    %cst_11 = arith.constant 0.000000e+00 : f32
    %13 = vector.broadcast %cst_11 : f32 to vector<8x32xf32>
    %14 = arith.maximumf %12, %13 : vector<8x32xf32>
    %c0_12 = arith.constant 0 : index
    %c0_13 = arith.constant 0 : index
    %15 = vector.load %arg7[%c0_12, %c0_13] : memref<1x128xf32, #tpu.memory_space<vmem>>, vector<1x128xf32>
    %c0_14 = arith.constant 0 : index
    %c0_15 = arith.constant 0 : index
    %16 = vector.load %arg6[%c0_14, %c0_15] : memref<32x128xf32, #tpu.memory_space<vmem>>, vector<32x128xf32>
    %cst_16 = arith.constant dense<0.000000e+00> : vector<8x128xf32>
    %17 = tpu.matmul %14, %16, %cst_16 {dimension_numbers = #tpu.dot_dimension_numbers<[1], [0], [0], [1], [0, 0, 1, 1], [], []>} : vector<8x32xf32>, vector<32x128xf32>, vector<8x128xf32> -> vector<8x128xf32>
    %18 = vector.broadcast %15 : vector<1x128xf32> to vector<8x128xf32>
    %19 = arith.addf %17, %18 : vector<8x128xf32>
    %20 = tpu.iota {dimensions = array<i32: 1>} : vector<8x128xi32>
    %c16_i32 = arith.constant 16 : i32
    %21 = vector.broadcast %c16_i32 : i32 to vector<8x128xi32>
    %22 = arith.cmpi slt, %20, %21 : vector<8x128xi32>
    %cst_17 = arith.constant 0.000000e+00 : f32
    %23 = vector.broadcast %cst_17 : f32 to vector<8x128xf32>
    %24 = arith.select %22, %19, %23 : vector<8x128xi1>, vector<8x128xf32>
    %cst_18 = arith.constant dense<0.000000e+00> : vector<8xf32>
    %25 = vector.multi_reduction <add>, %24, %cst_18 [1] : vector<8x128xf32> to vector<8xf32>
    %26 = vector.shape_cast %25 : vector<8xf32> to vector<8x1xf32>
    %cst_19 = arith.constant 6.250000e-02 : f32
    %27 = vector.broadcast %cst_19 : f32 to vector<8x1xf32>
    %28 = arith.mulf %26, %27 : vector<8x1xf32>
    %29 = vector.broadcast %28 : vector<8x1xf32> to vector<8x128xf32>
    %30 = arith.subf %19, %29 : vector<8x128xf32>
    %cst_20 = arith.constant 0.000000e+00 : f32
    %31 = vector.broadcast %cst_20 : f32 to vector<8x128xf32>
    %32 = arith.select %22, %30, %31 : vector<8x128xi1>, vector<8x128xf32>
    %33 = arith.mulf %32, %32 : vector<8x128xf32>
    %cst_21 = arith.constant dense<0.000000e+00> : vector<8xf32>
    %34 = vector.multi_reduction <add>, %33, %cst_21 [1] : vector<8x128xf32> to vector<8xf32>
    %35 = vector.shape_cast %34 : vector<8xf32> to vector<8x1xf32>
    %cst_22 = arith.constant 6.250000e-02 : f32
    %36 = vector.broadcast %cst_22 : f32 to vector<8x1xf32>
    %37 = arith.mulf %35, %36 : vector<8x1xf32>
    %cst_23 = arith.constant 9.99999974E-6 : f32
    %38 = vector.broadcast %cst_23 : f32 to vector<8x1xf32>
    %39 = arith.addf %37, %38 : vector<8x1xf32>
    %40 = math.rsqrt %39 : vector<8x1xf32>
    %41 = vector.broadcast %40 : vector<8x1xf32> to vector<8x128xf32>
    %42 = arith.mulf %32, %41 : vector<8x128xf32>
    %c0_24 = arith.constant 0 : index
    %c0_25 = arith.constant 0 : index
    %43 = vector.load %arg8[%c0_24, %c0_25] : memref<8x128xf32, #tpu.memory_space<vmem>>, vector<8x128xf32>
    tpu.vector_store %arg8[%c0_24, %c0_25], %42 {strides = array<i32>} : memref<8x128xf32, #tpu.memory_space<vmem>>, vector<8x128xf32>,
    return
  }
  func.func @transform_0(%arg0: i32) -> (i32, i32) {
    %c0_i32 = arith.constant 0 : i32
    %c0_i32_0 = arith.constant 0 : i32
    return %arg0, %c0_i32 : i32, i32
  }
  func.func @transform_1(%arg0: i32) -> (i32, i32) {
    %c0_i32 = arith.constant 0 : i32
    %c0_i32_0 = arith.constant 0 : i32
    %c0_i32_1 = arith.constant 0 : i32
    return %c0_i32, %c0_i32_0 : i32, i32
  }
  func.func @transform_2(%arg0: i32) -> (i32, i32) {
    %c0_i32 = arith.constant 0 : i32
    %c0_i32_0 = arith.constant 0 : i32
    %c0_i32_1 = arith.constant 0 : i32
    return %c0_i32, %c0_i32_0 : i32, i32
  }
  func.func @transform_3(%arg0: i32) -> (i32, i32) {
    %c0_i32 = arith.constant 0 : i32
    %c0_i32_0 = arith.constant 0 : i32
    %c0_i32_1 = arith.constant 0 : i32
    return %c0_i32, %c0_i32_0 : i32, i32
  }
  func.func @transform_4(%arg0: i32) -> (i32, i32) {
    %c0_i32 = arith.constant 0 : i32
    %c0_i32_0 = arith.constant 0 : i32
    %c0_i32_1 = arith.constant 0 : i32
    return %c0_i32, %c0_i32_0 : i32, i32
  }
  func.func @transform_5(%arg0: i32) -> (i32, i32) {
    %c0_i32 = arith.constant 0 : i32
    %c0_i32_0 = arith.constant 0 : i32
    %c0_i32_1 = arith.constant 0 : i32
    return %c0_i32, %c0_i32_0 : i32, i32
  }
  func.func @transform_6(%arg0: i32) -> (i32, i32) {
    %c0_i32 = arith.constant 0 : i32
    %c0_i32_0 = arith.constant 0 : i32
    %c0_i32_1 = arith.constant 0 : i32
    return %c0_i32, %c0_i32_0 : i32, i32
  }
  func.func @transform_7(%arg0: i32) -> (i32, i32) {
    %c0_i32 = arith.constant 0 : i32
    %c0_i32_0 = arith.constant 0 : i32
    return %arg0, %c0_i32 : i32, i32
  }
}

</mosaic_0001>

<bundles_post_ra>
// kernel: tpu_custom_call.1
= control target key start
LH: loop header
LB: loop body
LE: loop exit
PB: predicated region body
PF: predicated region fallthrough
CT: control target
= control target key end

     0   :  { %12 = vsyncpa [#allocation3], 0  ;;  %s693_s0 = inlined_call_operand.hbm [shape: f32[8,16], index: 0, kind: input, shape index: {}]   ;;  %s694_s1 = inlined_call_operand.hbm [shape: f32[16,32], index: 1, kind: input, shape index: {}]   ;;  %s695_s2 = inlined_call_operand.vmem [shape: f32[1,32], index: 2, kind: input, shape index: {}]   ;;  %s696_s3 = inlined_call_operand.hbm [shape: f32[32,32], index: 3, kind: input, shape index: {}]   ;;  %s697_s4 = inlined_call_operand.vmem [shape: f32[1,32], index: 4, kind: input, shape index: {}]   ;;  %s698_s5 = inlined_call_operand.hbm [shape: f32[32,128], index: 5, kind: input, shape index: {}]   ;;  %s699_s6 = inlined_call_operand.vmem [shape: f32[1,128], index: 6, kind: input, shape index: {}]   ;;  %s700_s7 = inlined_call_operand.hbm [shape: f32[8,128], index: 7, kind: output, shape index: {}]  }
   0x1   :  { %13 = vsyncpa [#allocation6], 0 }
   0x2   :  { %14 = vsyncpa [#allocation9], 0 }
   0x3   :  { %15 = vsyncpa [#allocation4], 0  ;;  %s562_s24 = smov [#allocation5]   ;;  %s444_s28 = scalar_lea.hbm %s694_s1, 256 }
   0x4   :  { %s31_s25 = sshll.u32 %s562_s24, 4  ;;  %p445_p0 = scmp.ne.s32.totalorder %s694_s1, %s444_s28  ;;  %s32_s25 = int_to_ptr.vmem [resolvable:$true] %s31_s25 }
   0x5   :  { %p448_p1 = scmp.lt.u32.totalorder %s444_s28, %s694_s1 }
   0x7   :  { %p450_p2 = pnand %p448_p1, %p445_p0 }
   0x9   :  { %453 = shalt.err (!%p450_p2)
}
   0xa   :  { %s454_s10 = scalar_lea.vmem %s32_s25, 256  ;;  %p459_p4 = scmp.lt.s32.totalorder %s32_s25, %s32_s25 }
   0xb   :  { %p455_p3 = scmp.ne.s32.totalorder %s32_s25, %s454_s10  ;;  %p460_p5 = scmp.lt.s32.totalorder %s454_s10, %s454_s10 }
   0xd   :  { %p461_p6 = por %p460_p5, %p459_p4 }
   0xf   :  { %p462_p7 = pnand %p461_p6, %p455_p3 }
  0x11   :  { %465 = shalt.err (!%p462_p7)
}
  0x12   :  { %s563_s11 = smov 128   ;;  %s564_s12 = smov 8  }
  0x13   :  { %37 = dma.hbm_to_vmem [thread:$0]  %s694_s1, 256, %s32_s25, [#allocation6], %s563_s11, %s563_s11, %s564_s12  }
  0x14   :  { %s565_s15 = smov [#allocation2]   ;;  %s566_s17 = smov [#allocation7]  }
  0x15   :  { %s22_s16 = sshll.u32 %s565_s15, 4  ;;  %s45_s18 = sshll.u32 %s566_s17, 4  ;;  %s23_s16 = int_to_ptr.vmem [resolvable:$true] %s22_s16  ;;  %s46_s18 = int_to_ptr.vmem [resolvable:$true] %s45_s18 }
  0x16   :  { %s466_s21 = scalar_lea.hbm %s693_s0, 128 }
  0x17   :  { %p467_p8 = scmp.ne.s32.totalorder %s693_s0, %s466_s21  ;;  %p470_p9 = scmp.lt.u32.totalorder %s466_s21, %s693_s0 }
  0x19   :  { %p472_p10 = pnand %p470_p9, %p467_p8 }
  0x1b   :  { %475 = shalt.err (!%p472_p10)
}
  0x1c   :  { %s476_s1 = scalar_lea.vmem %s23_s16, 128  ;;  %p481_p12 = scmp.lt.s32.totalorder %s23_s16, %s23_s16 }
  0x1d   :  { %p477_p11 = scmp.ne.s32.totalorder %s23_s16, %s476_s1  ;;  %p482_p13 = scmp.lt.s32.totalorder %s476_s1, %s476_s1 }
  0x1f   :  { %p483_p0 = por %p482_p13, %p481_p12 }
  0x21   :  { %p484_p1 = pnand %p483_p0, %p477_p11 }
  0x23   :  { %487 = shalt.err (!%p484_p1)
}
  0x24   :  { %25 = dma.hbm_to_vmem [thread:$0]  %s693_s0, 128, %s23_s16, [#allocation3]  }
  0x25   :  { %s488_s30 = scalar_lea.hbm %s696_s3, 512 }
  0x26   :  { %p489_p2 = scmp.ne.s32.totalorder %s696_s3, %s488_s30  ;;  %p492_p3 = scmp.lt.u32.totalorder %s488_s30, %s696_s3 }
  0x28   :  { %p494_p4 = pnand %p492_p3, %p489_p2 }
  0x2a   :  { %497 = shalt.err (!%p494_p4)
}
  0x2b   :  { %s498_s14 = scalar_lea.vmem %s46_s18, 512  ;;  %p503_p6 = scmp.lt.s32.totalorder %s46_s18, %s46_s18 }
  0x2c   :  { %p499_p5 = scmp.ne.s32.totalorder %s46_s18, %s498_s14  ;;  %p504_p7 = scmp.lt.s32.totalorder %s498_s14, %s498_s14 }
  0x2e   :  { %p505_p8 = por %p504_p7, %p503_p6 }
  0x30   :  { %p506_p9 = pnand %p505_p8, %p499_p5 }
  0x32   :  { %509 = shalt.err (!%p506_p9)
}
  0x33   :  { %51 = dma.hbm_to_vmem [thread:$0]  %s696_s3, 512, %s46_s18, [#allocation6], %s563_s11, %s563_s11, %s564_s12  }
  0x34   :  { %s567_s16 = smov [#allocation8]   ;;  %s510_s21 = scalar_lea.hbm %s698_s5, 512 }
  0x35   :  { %s59_s17 = sshll.u32 %s567_s16, 4  ;;  %p511_p10 = scmp.ne.s32.totalorder %s698_s5, %s510_s21  ;;  %s60_s17 = int_to_ptr.vmem [resolvable:$true] %s59_s17 }
  0x36   :  { %p514_p11 = scmp.lt.u32.totalorder %s510_s21, %s698_s5 }
  0x38   :  { %p516_p12 = pnand %p514_p11, %p511_p10 }
  0x3a   :  { %519 = shalt.err (!%p516_p12)
}
  0x3b   :  { %s520_s1 = scalar_lea.vmem %s60_s17, 512  ;;  %p525_p0 = scmp.lt.s32.totalorder %s60_s17, %s60_s17 }
  0x3c   :  { %p521_p13 = scmp.ne.s32.totalorder %s60_s17, %s520_s1  ;;  %p526_p1 = scmp.lt.s32.totalorder %s520_s1, %s520_s1 }
  0x3e   :  { %p527_p2 = por %p526_p1, %p525_p0 }
  0x40   :  { %p528_p3 = pnand %p527_p2, %p521_p13 }
  0x42   :  { %531 = shalt.err (!%p528_p3)
}
  0x43   :  { %65 = dma.hbm_to_vmem [thread:$0]  %s698_s5, 512, %s60_s17, [#allocation9], %s563_s11, %s563_s11, %s564_s12  }
  0x44   :  { %554 = dma.done.wait [#allocation3], 128  }
  0x45   :  { %555 = vsyncadd [#allocation3], 4294967168 }
  0x46   :  { %556 = dma.done.wait [#allocation6], 768  }
  0x47   :  { %557 = vsyncadd [#allocation6], 4294966528 }
  0x48   :  { %558 = dma.done.wait [#allocation9], 512  }
  0x49   :  { %559 = vsyncadd [#allocation9], 4294966784  ;;  %v568_v0 = vmov 0.0|0.0   ;;  %vm569_vm0 = vmmov 0   ;;  %v570_v1 = vmov 0.0   ;;  %v82_v2 = vld [vmem:[#allocation5] sm:$0xff]  ;;  %v335_v28 = vlaneseq }
  0x4a   :  { %417 = vmatprep.subr.bf16.mxu0 %v568_v0  ;;  %392 = vmatprep.mubr.msk.f32.mxu0 %vm569_vm0, %v570_v1  ;;  %v83_v3 = vld [vmem:[#allocation5 + $0x8] sm:$0xff]  ;;  %v166_v5 = vld [vmem:[#allocation7] sm:$0xff]  ;;  %v167_v6 = vld [vmem:[#allocation7 + $0x8] sm:$0xff]  ;;  %vm90_vm1 = vcmask 130048   ;;  %vm176_vm2 = vcmask 261120  }
  0x4b   :  { %420 = vmatprep.subr.bf16.mxu1 %v568_v0  ;;  %403 = vmatprep.mubr.msk.f32.mxu1 %vm569_vm0, %v570_v1  ;;  %v418_v4 = vpack.c.bf16 %v83_v3, %v82_v2  ;;  %v421_v7 = vpack.c.bf16 %v167_v6, %v166_v5  ;;  %v80_v8 = vld [vmem:[#allocation2] sm:$0xff]  ;;  %v168_v9 = vld [vmem:[#allocation7 + $0x10] sm:$0xff]  ;;  %v169_v10 = vld [vmem:[#allocation7 + $0x18] sm:$0xff]  ;;  %v336_v29 = vand.u32 127, %v335_v28 }
  0x4c   :  { %v424_v11 = vpack.c.bf16 %v169_v10, %v168_v9  ;;  %v252_v12 = vld [vmem:[#allocation8] sm:$0xff]  ;;  %v253_v13 = vld [vmem:[#allocation8 + $0x8] sm:$0xff]  ;;  %v254_v20 = vld [vmem:[#allocation8 + $0x10] sm:$0xff] }
  0x4d   :  { %419 = vmatpush3.bf16.msra.mxu0 %v418_v4  ;;  %422 = vmatpush3.bf16.msra.mxu1 %v421_v7  ;;  %v427_v14 = vpack.c.bf16 %v253_v13, %v252_v12  ;;  %v369_v15 = vld [vmem:[%s695_s2] ss:$0 sm:$0xff]  ;;  %v255_v21 = vld [vmem:[#allocation8 + $0x18] sm:$0xff]  ;;  %vm337_vm3 = vcmp.lt.s32.totalorder %v336_v29, 16 }
  0x4e   :  { %426 = vmatprep.subr.bf16.mxu0 %v568_v0  ;;  %423 = vmatprep.subr.bf16.mxu1 %v568_v0  ;;  %v430_v22 = vpack.c.bf16 %v255_v21, %v254_v20  ;;  %v371_v23 = vld [vmem:[%s697_s4] ss:$0 sm:$0xff]  ;;  %s571_s4 = smov [#allocation10]  }
  0x4f   :  { %v373_v30 = vld [vmem:[%s699_s6] ss:$0 sm:$0xff]  ;;  %s358_s28 = sshll.u32 %s571_s4, 4  ;;  %s359_s28 = int_to_ptr.vmem [resolvable:$true] %s358_s28 }
  0x50   :  { %393 = vmatmul.mubr.msk.f32.vlgmr.msra.gmra.mrb[0].mxu0 %vm90_vm1, %v80_v8  ;;  %s532_s6 = scalar_lea.vmem %s359_s28, 128  ;;  %p537_p5 = scmp.lt.s32.totalorder %s359_s28, %s359_s28 }
  0x51   :  { %414 = vmatprep.mubr.msk.f32.mxu0 %vm569_vm0, %v570_v1  ;;  %425 = vmatpush3.bf16.msra.mxu1 %v424_v11  ;;  %p533_p4 = scmp.ne.s32.totalorder %s359_s28, %s532_s6  ;;  %p538_p6 = scmp.lt.s32.totalorder %s532_s6, %s532_s6 }
  0x52   :  { %428 = vmatpush3.bf16.msra.mxu0 %v427_v14 }
  0x53   :  { %429 = vmatprep.subr.bf16.mxu0 %v568_v0  ;;  %p539_p7 = por %p538_p6, %p537_p5 }
  0x55   :  { %p540_p8 = pnand %p539_p7, %p533_p4 }
  0x56   :  { %431 = vmatpush3.bf16.msra.mxu0 %v430_v22 }
 0x123   :  { %v160_v16 = vpop.f32.mrb[0].mxu0 }
 0x124   :  { %v161_v17 = vadd.f32 %v369_v15, %v160_v16  ;;  %v394_v18 = vpop.f32.mrb[1].mxu0 }
 0x126   :  { %v164_v19 = vmax.f32 %v161_v17, 0.0 }
 0x128   :  { %404 = vmatmul.mubr.msk.f32.vlgmr.msra.gmra.mrb[0].mxu1 %vm176_vm2, %v164_v19 }
 0x1fb   :  { %v246_v24 = vpop.f32.mrb[0].mxu1 }
 0x1fc   :  { %v247_v25 = vadd.f32 %v371_v23, %v246_v24  ;;  %v405_v26 = vpop.f32.mrb[1].mxu1 }
 0x1fe   :  { %v250_v27 = vmax.f32 %v247_v25, 0.0 }
 0x200   :  { %415 = vmatmul.mubr.msk.f32.vlgmr.msra.gmra.mrb[2].mxu0 %vm176_vm2, %v250_v27 }
 0x2d3   :  { %v331_v31 = vpop.f32.mrb[2].mxu0 }
 0x2d4   :  { %v332_v32 = vadd.f32 %v373_v30, %v331_v31  ;;  %v416_v33 = vpop.f32.mrb[3].mxu0 }
 0x2d6   :  { %v338_v34 = vsel %vm337_vm3, %v332_v32, 0.0 }
 0x2d7   :  { %339 = vadd.xlane.f32.xlu0 %v338_v34 }
 0x364   :  { %v340_v35 = vpop.xlane.xlu0 %339 }
 0x365   :  { %v341_v36 = vmul.f32 0.0625, %v340_v35 }
 0x367   :  { %v342_v37 = vsub.f32 %v332_v32, %v341_v36 }
 0x369   :  { %v343_v38 = vsel %vm337_vm3, %v342_v37, 0.0 }
 0x36a   :  { %v344_v39 = vmul.f32 %v343_v38, %v343_v38 }
 0x36c   :  { %345 = vadd.xlane.f32.xlu0 %v344_v39 }
 0x3f9   :  { %v346_v40 = vpop.xlane.xlu0 %345 }
 0x3fa   :  { %v347_v41 = vmul.f32 0.0625, %v346_v40 }
 0x3fc   :  { %v348_v42 = vadd.f32 1e-05, %v347_v41 }
 0x3fe   :  { %442 = vrsqrt.f32 %v348_v42 }
 0x408   :  { %v443_v43 = vpop.eup %442 }
 0x409   :  { %v350_v44 = vmul.f32 %v443_v43, %v343_v38 }
 0x40b   :  { %351 = vst [vmem:[#allocation10] sm:$0xff] %v350_v44 }
 0x40c   :  { %543 = shalt.err (!%p540_p8)
}
 0x40d   :  { %s544_s8 = scalar_lea.hbm %s700_s7, 128 }
 0x40e   :  { %p545_p9 = scmp.ne.s32.totalorder %s700_s7, %s544_s8  ;;  %p548_p10 = scmp.lt.u32.totalorder %s544_s8, %s700_s7 }
 0x410   :  { %p550_p11 = pnand %p548_p10, %p545_p9 }
 0x412   :  { %553 = shalt.err (!%p550_p11)
}
 0x413   :  { %361 = dma.vmem_to_hbm [thread:$0]  %s359_s28, 128, %s700_s7, [#allocation4]  }
 0x414   :  { %560 = dma.done.wait [#allocation4], 128  }
 0x415   :  { %561 = vsyncadd [#allocation4], 4294967168 }
 0x416   :  { %365 = vsyncpa [#allocation3], 1 }
 0x417   :  { %366 = vsyncpa [#allocation6], 1 }
 0x418   :  { %367 = vsyncpa [#allocation9], 1 }
 0x419   :  { %368 = vsyncpa [#allocation4], 1 }

</bundles_post_ra>
